<compile_context>
chip_gen: v6e
topology: v6e:2x2x1
jax: 0.10.0
libtpu: 0.0.40
codegen_flags: <defaults>
</compile_context>

<pallas_src>
import functools
import math

import jax
import jax.numpy as jnp
from jax.experimental import pallas as pl
from jax.experimental.pallas import tpu as pltpu


def _cdiv(a, b):
    return (a + b - 1) // b


def _round_up(a, b):
    return _cdiv(a, b) * b


_MIB = 1024 * 1024


def _vmem_capacity_bytes():
    try:
        return int(pltpu.get_tpu_info().vmem_capacity_bytes)
    except Exception:
        return 64 * _MIB  # conservative fallback: assume v7x (smallest VMEM)


_VMEM_CAP = _vmem_capacity_bytes()
if _VMEM_CAP >= 128 * _MIB:            # v5e / v6e: 128 MiB VMEM, 1 TensorCore
    _VMEM_TILE_BUDGET = 88 * _MIB
    _VMEM_LIMIT_BYTES = 112 * _MIB
    _TWO_CORES = False
    _TM_CAP, _TN_CAP = 1024, 2048
else:                                   # v7x: 64 MiB VMEM per TC, 2 TensorCores
    _VMEM_TILE_BUDGET = 36 * _MIB      # leave Mosaic internal-scratch headroom
    _VMEM_LIMIT_BYTES = 48 * _MIB
    _TWO_CORES = True
    _TM_CAP, _TN_CAP = 512, 1024


def _largest_aligned_divisor(total, cap, align=128):
    """Largest multiple of `align` that divides `total` and is <= cap."""
    cap = max(align, (min(cap, total) // align) * align)
    for cand in range(cap, align - 1, -align):
        if total % cand == 0:
            return cand
    return align


def _weight_pad_dims(K, N, tn_cap):
    """One-time (init) padded weight dims: friendly K (reduction) and N (lane)."""
    # K: keep unpadded if it fits one block; otherwise pad to the largest tile
    # in (1024..128) whose padding overhead stays within ~6%.
    if K <= 1024:
        Kp = K
    else:
        cands = (1024, 512, 256, 128)
        best = min(_round_up(K, c) for c in cands)
        Kp = best
        for c in cands:
            if _round_up(K, c) <= best + best // 16:
                Kp = _round_up(K, c)
                break
    # N: lane dim, always 128-aligned; same minimal-padding rule vs. tile ladder.
    Nr0 = _round_up(N, 128)
    if Nr0 <= tn_cap:
        Np = Nr0
    else:
        cands = tuple(c for c in (2048, 1024, 512, 256, 128) if c <= tn_cap)
        best = min(_round_up(N, c) for c in cands)
        Np = best
        for c in cands:
            if _round_up(N, c) <= best + best // 16:
                Np = _round_up(N, c)
                break
    return Kp, Np


def _choose_tiles(M, Np, Kp, itemsize, budget, two_cores, w_bufs, tm_cap, tn_cap):
    """Pick (tm, tn, tk) maximizing output-tile arithmetic intensity under VMEM."""
    # --- tk: cap at 1024 (intensity is independent of tk); prefer 256-multiples.
    if Kp % 128 != 0 or Kp <= 1024:
        tk = Kp                                     # single full-K block
    else:
        tk = _largest_aligned_divisor(Kp, 1024, 128)
        if Kp % 256 == 0:
            tk256 = _largest_aligned_divisor(Kp, 1024, 256)
            if tk256 * 2 >= tk:
                tk = tk256
    # --- tn: largest lane-dense tile dividing the (pre-padded) N.
    tn = _largest_aligned_divisor(Np, min(tn_cap, Np), 128)
    # --- tm: full M when it fits one tile (zero padding); else avoid heavy waste.
    if M <= tm_cap:
        tm = max(M, 1)
    else:
        tm = 128
        for cand in (tm_cap, 512, 256, 128):
            if cand <= tm_cap and (_round_up(M, cand) - M) * 8 <= M:
                tm = cand
                break
    # --- v7x only: keep >= 2 parallel output blocks, splitting M first.
    if two_cores and _cdiv(M, tm) * (Np // tn) < 2:
        if M > 16:
            tm = _round_up(_cdiv(M, 2), 16)
        elif tn > 128:
            tn = _largest_aligned_divisor(Np, tn // 2, 128)

    # --- VMEM check (double-buffered x/out, w_bufs-deep weights, f32 acc).
    def vmem(tm_, tn_, tk_):
        return (2 * tm_ * tk_ * itemsize + w_bufs * tk_ * tn_ * itemsize
                + 2 * tm_ * tn_ * itemsize + tm_ * tn_ * 4)

    while vmem(tm, tn, tk) > budget:
        if tn > 128:
            tn = _largest_aligned_divisor(Np, tn - 128, 128)
        elif tm > 128:
            tm = _round_up(max(tm // 2, 16), 16)
        elif tk > 256 and Kp % 128 == 0:
            tk = _largest_aligned_divisor(Kp, tk - 128, 128)
        else:
            break
    return tm, tn, tk


def _weight_block_spec(tk, tn, deep_buffer):
    idx = lambda i, j, k: (k, j)
    if deep_buffer:
        try:
            # Deeper buffering on the dominant (weight) DMA stream for decode shapes.
            return pl.BlockSpec((tk, tn), idx, pipeline_mode=pl.Buffered(3))
        except Exception:
            pass
    return pl.BlockSpec((tk, tn), idx)


def _linear_kernel_single_k(*refs, has_bias):
    """K fits one grid step: write (x @ w + bias) straight to the output tile."""
    if has_bias:
        x_ref, w_ref, b_ref, o_ref = refs
    else:
        x_ref, w_ref, o_ref = refs
        b_ref = None
    acc = jnp.dot(x_ref[...], w_ref[...], preferred_element_type=jnp.float32)
    if has_bias:
        acc = acc + b_ref[...].astype(jnp.float32)
    o_ref[...] = acc.astype(o_ref.dtype)


def _linear_kernel_multi_k(*refs, has_bias):
    """K split over grid axis 2; f32 accumulator without a zero-init RMW."""
    if has_bias:
        x_ref, w_ref, b_ref, o_ref, acc_ref = refs
    else:
        x_ref, w_ref, o_ref, acc_ref = refs
        b_ref = None
    k = pl.program_id(2)
    part = jnp.dot(x_ref[...], w_ref[...], preferred_element_type=jnp.float32)

    @pl.when(k == 0)
    def _():
        acc_ref[...] = part            # overwrite: saves a full-tile zero store

    @pl.when(k > 0)
    def _():
        acc_ref[...] += part

    @pl.when(k == pl.num_programs(2) - 1)
    def _():
        acc = acc_ref[...]
        if has_bias:
            acc = acc + b_ref[...].astype(jnp.float32)
        o_ref[...] = acc.astype(o_ref.dtype)


@functools.partial(jax.jit, static_argnames=("n_out",))
def pallas_linear(x, weight_t, bias=None, *, n_out=None):
    """y = x @ weight_t (+ bias).

    x: (..., K); weight_t: (Kp, Np) pre-transposed (and zero-padded) weight;
    bias: (1, Np) f32 or None.  Returns (..., n_out).
    """
    *lead, K = x.shape
    Kp, Np = weight_t.shape
    if n_out is None:
        n_out = Np
    M = int(math.prod(lead)) if lead else 1
    out_dtype = x.dtype
    itemsize = jnp.dtype(out_dtype).itemsize

    x2d = x.reshape(M, K)
    if Kp != K:                         # rare: ragged K > 1024 (weight K-padded at init)
        x2d = jnp.pad(x2d, ((0, 0), (0, Kp - K)))

    has_bias = bias is not None
    w_bufs = 3 if M <= 128 else 2       # budget for the deeper weight buffering
    tm, tn, tk = _choose_tiles(M, Np, Kp, itemsize, _VMEM_TILE_BUDGET,
                               _TWO_CORES, w_bufs, _TM_CAP, _TN_CAP)
    Mp = _round_up(M, tm)
    if Mp != M:
        x2d = jnp.pad(x2d, ((0, Mp - M), (0, 0)))

    grid = (Mp // tm, Np // tn, Kp // tk)
    n_i, n_j, n_k = grid
    deep_w = (M <= 128) and (n_j * n_k >= 3)   # decode: weight-stream bound

    in_specs = [pl.BlockSpec((tm, tk), lambda i, j, k: (i, k)),
                _weight_block_spec(tk, tn, deep_w)]
    args = [x2d, weight_t]
    if has_bias:
        in_specs.append(pl.BlockSpec((1, tn), lambda i, j, k: (0, j)))
        args.append(bias)

    if n_k == 1:
        kernel = functools.partial(_linear_kernel_single_k, has_bias=has_bias)
        scratch = []
    else:
        kernel = functools.partial(_linear_kernel_multi_k, has_bias=has_bias)
        scratch = [pltpu.VMEM((tm, tn), jnp.float32)]

    # Streamed-traffic estimate: W once per M row-panel, X once per N col-panel.
    flops = 2 * Mp * Np * Kp
    bytes_accessed = (n_i * Kp * Np * itemsize
                      + n_j * Mp * Kp * itemsize
                      + Mp * Np * itemsize
                      + (n_i * Np * 4 if has_bias else 0))

    y2d = pl.pallas_call(
        kernel,
        out_shape=jax.ShapeDtypeStruct((Mp, Np), out_dtype),
        grid_spec=pltpu.PrefetchScalarGridSpec(
            num_scalar_prefetch=0,
            grid=grid,
            in_specs=in_specs,
            out_specs=pl.BlockSpec((tm, tn), lambda i, j, k: (i, j)),
            scratch_shapes=scratch,
        ),
        compiler_params=pltpu.CompilerParams(
            dimension_semantics=("parallel", "parallel", "arbitrary"),
            vmem_limit_bytes=_VMEM_LIMIT_BYTES,
        ),
        cost_estimate=pl.CostEstimate(
            flops=flops, transcendentals=0, bytes_accessed=bytes_accessed
        ),
    )(*args)

    if Mp != M or Np != n_out:
        y2d = y2d[:M, :n_out]
    return y2d.reshape(*lead, n_out)


class PallasLinear:
    """Mirror of the PyTorch `Linear` module (bf16 weights, bias=False default)."""

    dtype = jnp.bfloat16

    def __init__(self, in_features, out_features, bias=False, *, key):
        self.in_features = in_features
        self.out_features = out_features
        wkey, bkey = jax.random.split(key)
        # Deterministic synthetic init (the torch module uses torch.empty; any values OK).
        self.weight = (
            jax.random.normal(wkey, (out_features, in_features), jnp.float32)
            * (1.0 / in_features ** 0.5)
        ).astype(PallasLinear.dtype)
        # bf16 weight => element_size > 1 => plain F.linear path; no quant scale.
        self.scale = None

        # One-time layout work: pre-transpose to (K, N) and zero-pad K/N to
        # kernel-friendly sizes (never repeated per call).
        Kp, Np = _weight_pad_dims(in_features, out_features, _TN_CAP)
        wt = jnp.asarray(self.weight.T)                      # (K, N), MXU-native
        if (Kp, Np) != (in_features, out_features):
            wt = jnp.pad(wt, ((0, Kp - in_features), (0, Np - out_features)))
        self.weight_t = wt

        if bias:
            self.bias = jax.random.normal(bkey, (out_features,), jnp.float32)
            b2d = self.bias.reshape(1, out_features).astype(jnp.float32)
            if Np != out_features:
                b2d = jnp.pad(b2d, ((0, 0), (0, Np - out_features)))
            self.bias_padded = b2d
        else:
            self.bias = None
            self.bias_padded = None

    def __call__(self, x):
        return pallas_linear(x, self.weight_t, self.bias_padded,
                             n_out=self.out_features)


if __name__ == "__main__":
    key = jax.random.PRNGKey(0)
    k_x, k_l, k_x2, k_l2, k_x3, k_l3 = jax.random.split(key, 6)

    # --- Test 1: small, no bias (module default), single-K kernel path ---
    batch, seq, in_f, out_f = 2, 8, 256, 128
    x = jax.random.normal(k_x, (batch, seq, in_f), jnp.float32).astype(jnp.bfloat16)
    layer = PallasLinear(in_f, out_f, bias=False, key=k_l)
    y = jax.block_until_ready(layer(x))
    y_ref = jnp.einsum("bsk,nk->bsn", x.astype(jnp.float32),
                       layer.weight.astype(jnp.float32))
    assert y.shape == (batch, seq, out_f)
    assert jnp.allclose(y.astype(jnp.float32), y_ref, atol=2e-2, rtol=2e-2)

    # --- Test 2: ragged M (full-dim tm, no padding) + fused bias ---
    batch2, seq2, in2, out2 = 2, 7, 384, 256
    x2 = jax.random.normal(k_x2, (batch2, seq2, in2), jnp.float32).astype(jnp.bfloat16)
    layer2 = PallasLinear(in2, out2, bias=True, key=k_l2)
    y2 = jax.block_until_ready(layer2(x2))
    y2_ref = jnp.einsum("bsk,nk->bsn", x2.astype(jnp.float32),
                        layer2.weight.astype(jnp.float32)) + layer2.bias
    assert y2.shape == (batch2, seq2, out2)
    assert jnp.allclose(y2.astype(jnp.float32), y2_ref, atol=2e-2, rtol=2e-2)

    # --- Test 3: K > 1024 (multi-K accumulator path) + ragged N (pad/slice) ---
    batch3, seq3, in3, out3 = 2, 4, 1536, 200
    x3 = jax.random.normal(k_x3, (batch3, seq3, in3), jnp.float32).astype(jnp.bfloat16)
    layer3 = PallasLinear(in3, out3, bias=True, key=k_l3)
    y3 = jax.block_until_ready(layer3(x3))
    y3_ref = jnp.einsum("bsk,nk->bsn", x3.astype(jnp.float32),
                        layer3.weight.astype(jnp.float32)) + layer3.bias
    assert y3.shape == (batch3, seq3, out3)
    assert jnp.allclose(y3.astype(jnp.float32), y3_ref, atol=3e-2, rtol=2e-2)

    print("KERNEL_OK")
</pallas_src>

<mosaic_0001>
module attributes {stable_mosaic.version = 11 : i64} {
  func.func @_linear_kernel_single_k(%arg0: i32, %arg1: i32, %arg2: i32, %arg3: memref<16x256xbf16, #tpu.memory_space<vmem>>, %arg4: memref<256x128xbf16, #tpu.memory_space<vmem>>, %arg5: memref<16x128xbf16, #tpu.memory_space<vmem>>) attributes {dimension_semantics = [#tpu.dimension_semantics<parallel>, #tpu.dimension_semantics<parallel>, #tpu.dimension_semantics<arbitrary>], iteration_bounds = array<i64: 1, 1, 1>, scalar_prefetch = 0 : i64, scratch_operands = 0 : i64, tpu.core_type = #tpu.core_type<tc>, window_params = [{transform_indices = @transform_0, window_bounds = array<i64: 16, 256>}, {transform_indices = @transform_1, window_bounds = array<i64: 256, 128>}, {transform_indices = @transform_2, window_bounds = array<i64: 16, 128>}]} {
    %c0 = arith.constant 0 : index
    %c0_0 = arith.constant 0 : index
    %0 = vector.load %arg3[%c0, %c0_0] : memref<16x256xbf16, #tpu.memory_space<vmem>>, vector<16x256xbf16>
    %c0_1 = arith.constant 0 : index
    %c0_2 = arith.constant 0 : index
    %1 = vector.load %arg4[%c0_1, %c0_2] : memref<256x128xbf16, #tpu.memory_space<vmem>>, vector<256x128xbf16>
    %cst = arith.constant dense<0.000000e+00> : vector<16x128xf32>
    %2 = tpu.matmul %0, %1, %cst {dimension_numbers = #tpu.dot_dimension_numbers<[1], [0], [0], [1], [0, 0, 1, 1], [], []>} : vector<16x256xbf16>, vector<256x128xbf16>, vector<16x128xf32> -> vector<16x128xf32>
    %3 = arith.truncf %2 : vector<16x128xf32> to vector<16x128xbf16>
    %c0_3 = arith.constant 0 : index
    %c0_4 = arith.constant 0 : index
    %4 = vector.load %arg5[%c0_3, %c0_4] : memref<16x128xbf16, #tpu.memory_space<vmem>>, vector<16x128xbf16>
    tpu.vector_store %arg5[%c0_3, %c0_4], %3 {strides = array<i32>} : memref<16x128xbf16, #tpu.memory_space<vmem>>, vector<16x128xbf16>,
    return
  }
  func.func @transform_0(%arg0: i32, %arg1: i32, %arg2: i32) -> (i32, i32) {
    %c0_i32 = arith.constant 0 : i32
    return %arg0, %arg2 : i32, i32
  }
  func.func @transform_1(%arg0: i32, %arg1: i32, %arg2: i32) -> (i32, i32) {
    %c0_i32 = arith.constant 0 : i32
    return %arg2, %arg1 : i32, i32
  }
  func.func @transform_2(%arg0: i32, %arg1: i32, %arg2: i32) -> (i32, i32) {
    %c0_i32 = arith.constant 0 : i32
    return %arg0, %arg1 : i32, i32
  }
}

</mosaic_0001>

<bundles_post_ra>
// kernel: pallas_linear.1
= control target key start
LH: loop header
LB: loop body
LE: loop exit
PB: predicated region body
PF: predicated region fallthrough
CT: control target
= control target key end

     0   :  { %7 = vsyncpa [#allocation3], 0  ;;  %s428_s0 = inlined_call_operand.hbm [shape: bf16[16,256], index: 0, kind: input, shape index: {}]   ;;  %s429_s1 = inlined_call_operand.hbm [shape: bf16[256,128], index: 1, kind: input, shape index: {}]   ;;  %s430_s2 = inlined_call_operand.hbm [shape: bf16[16,128], index: 2, kind: output, shape index: {}]  }
   0x1   :  { %8 = vsyncpa [#allocation6], 0 }
   0x2   :  { %9 = vsyncpa [#allocation4], 0  ;;  %s391_s9 = smov [#allocation2]  }
   0x3   :  { %s15_s10 = sshll.u32 %s391_s9, 4  ;;  %s16_s10 = int_to_ptr.vmem [resolvable:$true] %s15_s10 }
   0x4   :  { %s333_s11 = scalar_lea.vmem %s16_s10, 256  ;;  %p338_p1 = scmp.lt.s32.totalorder %s16_s10, %s16_s10 }
   0x5   :  { %p334_p0 = scmp.ne.s32.totalorder %s16_s10, %s333_s11  ;;  %p339_p2 = scmp.lt.s32.totalorder %s333_s11, %s333_s11 }
   0x7   :  { %p340_p3 = por %p339_p2, %p338_p1 }
   0x9   :  { %p341_p4 = pnand %p340_p3, %p334_p0 }
   0xb   :  { %344 = shalt.err (!%p341_p4)
}
   0xc   :  { %s392_s12 = smov 128   ;;  %s393_s13 = smov 8  }
   0xd   :  { %21 = dma.hbm_to_vmem [thread:$0]  %s428_s0, 256, %s16_s10, [#allocation3], %s392_s12, %s392_s12, %s393_s13  }
   0xe   :  { %s394_s16 = smov [#allocation5]  }
   0xf   :  { %s27_s17 = sshll.u32 %s394_s16, 4  ;;  %s28_s17 = int_to_ptr.vmem [resolvable:$true] %s27_s17 }
  0x10   :  { %s353_s18 = scalar_lea.vmem %s28_s17, 2048  ;;  %p358_p6 = scmp.lt.s32.totalorder %s28_s17, %s28_s17 }
  0x11   :  { %p354_p5 = scmp.ne.s32.totalorder %s28_s17, %s353_s18  ;;  %p359_p7 = scmp.lt.s32.totalorder %s353_s18, %s353_s18 }
  0x13   :  { %p360_p8 = por %p359_p7, %p358_p6 }
  0x15   :  { %p361_p9 = pnand %p360_p8, %p354_p5 }
  0x17   :  { %364 = shalt.err (!%p361_p9)
}
  0x18   :  { %s395_s19 = smov 64   ;;  %s396_s20 = smov 4  }
  0x19   :  { %33 = dma.hbm_to_vmem [thread:$0]  %s429_s1, 2048, %s28_s17, [#allocation6], %s395_s19, %s395_s19, %s396_s20  }
  0x1a   :  { %385 = dma.done.wait [#allocation3], 256  }
  0x1b   :  { %386 = vsyncadd [#allocation3], 4294967040 }
  0x1c   :  { %387 = dma.done.wait [#allocation6], 2048  }
  0x1d   :  { %388 = vsyncadd [#allocation6], 4294965248  ;;  %v306_v0 = vld [vmem:[#allocation5 + $0x78] sm:$0xff]   ;;  %v308_v2 = vld [vmem:[#allocation5 + $0x70] sm:$0xff]   ;;  %s397_s0 = smov [#allocation7]  }
  0x1e   :  { %v307_v1 = vld [vmem:[#allocation5 + $0x38] sm:$0xff]   ;;  %277 = vmatprep.subr.bf16.mxu0 %v306_v0  ;;  %v309_v3 = vld [vmem:[#allocation5 + $0x30] sm:$0xff]   ;;  %v310_v4 = vld [vmem:[#allocation5 + $0x68] sm:$0xff]   ;;  %s237_s1 = sshll.u32 %s397_s0, 4  ;;  %s238_s1 = int_to_ptr.vmem [resolvable:$true] %s237_s1 }
  0x1f   :  { %278 = vmatpush3.bf16.msra.mxu0 %v307_v1  ;;  %v311_v5 = vld [vmem:[#allocation5 + $0x28] sm:$0xff]   ;;  %v312_v6 = vld [vmem:[#allocation5 + $0x60] sm:$0xff]   ;;  %v314_v8 = vld [vmem:[#allocation5 + $0x58] sm:$0xff]   ;;  %s365_s23 = scalar_lea.vmem %s238_s1, 128  ;;  %p370_p11 = scmp.lt.s32.totalorder %s238_s1, %s238_s1 }
  0x20   :  { %279 = vmatprep.subr.bf16.mxu0 %v308_v2  ;;  %v313_v7 = vld [vmem:[#allocation5 + $0x20] sm:$0xff]   ;;  %v315_v9 = vld [vmem:[#allocation5 + $0x18] sm:$0xff]   ;;  %v316_v10 = vld [vmem:[#allocation5 + $0x50] sm:$0xff]   ;;  %p366_p10 = scmp.ne.s32.totalorder %s238_s1, %s365_s23  ;;  %p371_p12 = scmp.lt.s32.totalorder %s365_s23, %s365_s23 }
  0x21   :  { %v324_v11 = vld [vmem:[#allocation2 + $0x4] ss:$8 sps:$4 sm:$0xff]   ;;  %v318_v13 = vld [vmem:[#allocation5 + $0x48] sm:$0xff]   ;;  %v320_v15 = vld [vmem:[#allocation5 + $0x40] sm:$0xff]  }
  0x22   :  { %v317_v12 = vld [vmem:[#allocation5 + $0x10] sm:$0xff]   ;;  %213 = vmatprep.mubr.bf16.mxu0 %v324_v11  ;;  %v319_v14 = vld [vmem:[#allocation5 + $0x8] sm:$0xff]   ;;  %v321_v16 = vld [vmem:[#allocation5] sm:$0xff]   ;;  %p372_p13 = por %p371_p12, %p370_p11 }
  0x23   :  { %280 = vmatpush3.bf16.msra.mxu0 %v309_v3  ;;  %v322_v17 = vld [vmem:[#allocation2] ss:$8 sps:$4 sm:$0xff]  }
  0x24   :  { %281 = vmatprep.subr.bf16.mxu0 %v310_v4  ;;  %p373_p0 = pnand %p372_p13, %p366_p10 }
  0x27   :  { %282 = vmatpush3.bf16.msra.mxu0 %v311_v5 }
  0x28   :  { %283 = vmatprep.subr.bf16.mxu0 %v312_v6 }
  0x2b   :  { %284 = vmatpush3.bf16.msra.mxu0 %v313_v7 }
  0x2c   :  { %285 = vmatprep.subr.bf16.mxu0 %v314_v8 }
  0x2f   :  { %286 = vmatpush3.bf16.msra.mxu0 %v315_v9 }
  0x30   :  { %287 = vmatprep.subr.bf16.mxu0 %v316_v10 }
  0x33   :  { %288 = vmatpush3.bf16.msra.mxu0 %v317_v12 }
  0x34   :  { %289 = vmatprep.subr.bf16.mxu0 %v318_v13 }
  0x37   :  { %290 = vmatpush3.bf16.msra.mxu0 %v319_v14 }
  0x38   :  { %291 = vmatprep.subr.bf16.mxu0 %v320_v15 }
  0x3b   :  { %292 = vmatpush3.bf16.msra.mxu0 %v321_v16 }
  0x3e   :  { %214 = vmatmul.mubr.bf16.vlgmr.msra.gmra.mxu0 %v322_v17 }
  0xfe   :  { %v293_v18 = vpop.f32.mrf.mxu0 }
 0x100   :  { %v294_v19 = vpop.f32.mrf.mxu0 }
 0x101   :  { %v295_v22 = vadd.f32 %v294_v19, %v293_v18 }
 0x102   :  { %v296_v20 = vpop.f32.mrf.mxu0 }
 0x104   :  { %v297_v21 = vpop.f32.mrf.mxu0 }
 0x105   :  { %v298_v23 = vadd.f32 %v297_v21, %v296_v20 }
 0x107   :  { %v275_v24 = vpack.c.bf16 %v298_v23, %v295_v22 }
 0x109   :  { %276 = vst [vmem:[#allocation7] sm:$0xff] %v275_v24  }
 0x10a   :  { %376 = shalt.err (!%p373_p0)
}
 0x10b   :  { %243 = dma.vmem_to_hbm [thread:$0]  %s238_s1, 128, %s430_s2, [#allocation4], %s395_s19, %s395_s19, %s396_s20  }
 0x10c   :  { %389 = dma.done.wait [#allocation4], 128  }
 0x10d   :  { %390 = vsyncadd [#allocation4], 4294967168 }
 0x10e   :  { %247 = vsyncpa [#allocation3], 1 }
 0x10f   :  { %248 = vsyncpa [#allocation6], 1 }
 0x110   :  { %249 = vsyncpa [#allocation4], 1 }

</bundles_post_ra>
